<compile_context>
chip_gen: v6e
topology: v6e:2x2x1
jax: 0.10.0
libtpu: 0.0.40
codegen_flags: <defaults>
</compile_context>

<pallas_src>
import jax
import jax.numpy as jnp
from jax.experimental import pallas as pl
from jax.experimental.pallas import tpu as pltpu

_LANE = 128
_TARGET_TILE_BYTES = 2 * 1024 * 1024  # ~2 MiB/tile; x4 double-buffered in/out = 8 MiB VMEM


def _squared_relu_kernel(x_ref, o_ref):
    x = x_ref[...]                     # compute in the input dtype (no upcast)
    r = jnp.maximum(x, 0)
    o_ref[...] = r * r


def _choose_layout(n: int, itemsize: int):
    """Pick (rows, cols, block_rows) for a lane-dense 2D slab of n elements."""
    sub = max(8, 32 // itemsize)       # sublane packing: 8 f32, 16 bf16, 32 int8
    # widest lane-dense column count that divides n and leaves >= sub rows
    cols = _LANE
    for c in (4096, 2048, 1024, 512, 256):
        if n % c == 0 and (n // c) >= sub:
            cols = c
            break
    rows = n // cols

    # size block_rows for ~_TARGET_TILE_BYTES, rounded to the sublane packing
    tgt = max(sub, _TARGET_TILE_BYTES // (cols * itemsize))
    tgt = (tgt // sub) * sub
    if rows > tgt:
        block_rows = tgt               # ragged last block is masked by Pallas
    else:
        # whole slab fits in one tile; still try to expose >= 2 grid steps so
        # v7x's two TensorCores both get work on a "parallel" axis.
        half = ((rows + 1) // 2 + sub - 1) // sub * sub
        block_rows = half if sub <= half < rows else rows
    return rows, cols, block_rows


def squared_relu(x: jax.Array) -> jax.Array:
    """y = relu(x)**2, elementwise, via a Pallas TPU kernel."""
    orig_shape = x.shape
    dtype = x.dtype
    n = x.size

    if n == 0:
        return x
    if n % _LANE != 0:
        # TODO(synk): sizes that aren't a multiple of 128 lanes — a standalone
        # HBM-bound kernel gains nothing for this rare/tiny ragged case; let
        # XLA handle (and fuse) it instead of re-introducing a pad+slice copy.
        return jnp.square(jnp.maximum(x, 0)).astype(dtype)

    itemsize = jnp.dtype(dtype).itemsize
    rows, cols, block_rows = _choose_layout(n, itemsize)

    x2d = x.reshape(rows, cols)            # contiguous reshape: no extra HBM copy
    grid = (pl.cdiv(rows, block_rows),)    # partial last block handled by Pallas

    out2d = pl.pallas_call(
        _squared_relu_kernel,
        out_shape=jax.ShapeDtypeStruct((rows, cols), dtype),
        grid_spec=pltpu.PrefetchScalarGridSpec(
            num_scalar_prefetch=0,
            grid=grid,
            in_specs=[pl.BlockSpec((block_rows, cols), lambda i: (i, 0))],
            out_specs=pl.BlockSpec((block_rows, cols), lambda i: (i, 0)),
        ),
        compiler_params=pltpu.CompilerParams(
            dimension_semantics=("parallel",),
        ),
    )(x2d)

    return out2d.reshape(orig_shape)


if __name__ == "__main__":
    key = jax.random.PRNGKey(0)
    # NCHW input, like the PyTorch module receives inside MetaFormer.
    x = jax.random.normal(key, (2, 4, 16, 16), dtype=jnp.float32)

    y = jax.block_until_ready(squared_relu(x))
    y_ref = jnp.square(jnp.maximum(x, 0.0))
    assert y.shape == x.shape and y.dtype == x.dtype
    assert jnp.allclose(y, y_ref, atol=1e-6, rtol=1e-6)

    # ragged-rows case (grid has a partial last block), f32
    x2 = jax.random.normal(jax.random.PRNGKey(1), (3, 8, 24, 24), dtype=jnp.float32)
    y2 = jax.block_until_ready(squared_relu(x2))
    y2_ref = jnp.square(jnp.maximum(x2, 0.0))
    assert jnp.allclose(y2, y2_ref, atol=1e-6, rtol=1e-6)

    # bf16 case (stays in bf16 inside the kernel, sublane packing = 16)
    x3 = jax.random.normal(jax.random.PRNGKey(2), (2, 64, 32, 32)).astype(jnp.bfloat16)
    y3 = jax.block_until_ready(squared_relu(x3))
    y3_ref = jnp.square(jnp.maximum(x3, 0))
    assert y3.dtype == jnp.bfloat16
    assert jnp.allclose(y3.astype(jnp.float32), y3_ref.astype(jnp.float32),
                        atol=1e-2, rtol=1e-2)

    print("KERNEL_OK")
</pallas_src>

<mosaic_0001>
module attributes {stable_mosaic.version = 11 : i64} {
  func.func @_squared_relu_kernel(%arg0: i32, %arg1: memref<8x256xf32, #tpu.memory_space<vmem>>, %arg2: memref<8x256xf32, #tpu.memory_space<vmem>>) attributes {dimension_semantics = [#tpu.dimension_semantics<parallel>], iteration_bounds = array<i64: 1>, scalar_prefetch = 0 : i64, scratch_operands = 0 : i64, tpu.core_type = #tpu.core_type<tc>, window_params = [{transform_indices = @transform_0, window_bounds = array<i64: 8, 256>}, {transform_indices = @transform_1, window_bounds = array<i64: 8, 256>}]} {
    %c0 = arith.constant 0 : index
    %c0_0 = arith.constant 0 : index
    %0 = vector.load %arg1[%c0, %c0_0] : memref<8x256xf32, #tpu.memory_space<vmem>>, vector<8x256xf32>
    %cst = arith.constant 0.000000e+00 : f32
    %1 = vector.broadcast %cst : f32 to vector<8x256xf32>
    %2 = arith.maximumf %0, %1 : vector<8x256xf32>
    %3 = arith.mulf %2, %2 : vector<8x256xf32>
    %c0_1 = arith.constant 0 : index
    %c0_2 = arith.constant 0 : index
    %4 = vector.load %arg2[%c0_1, %c0_2] : memref<8x256xf32, #tpu.memory_space<vmem>>, vector<8x256xf32>
    tpu.vector_store %arg2[%c0_1, %c0_2], %3 {strides = array<i32>} : memref<8x256xf32, #tpu.memory_space<vmem>>, vector<8x256xf32>,
    return
  }
  func.func @transform_0(%arg0: i32) -> (i32, i32) {
    %c0_i32 = arith.constant 0 : i32
    %c0_i32_0 = arith.constant 0 : i32
    return %arg0, %c0_i32 : i32, i32
  }
  func.func @transform_1(%arg0: i32) -> (i32, i32) {
    %c0_i32 = arith.constant 0 : i32
    %c0_i32_0 = arith.constant 0 : i32
    return %arg0, %c0_i32 : i32, i32
  }
}

</mosaic_0001>

<bundles_post_ra>
// kernel: tpu_custom_call.1
= control target key start
LH: loop header
LB: loop body
LE: loop exit
PB: predicated region body
PF: predicated region fallthrough
CT: control target
= control target key end

     0   :  { %6 = vsyncpa [#allocation3], 0  ;;  %s108_s0 = inlined_call_operand.hbm [shape: f32[8,256], index: 0, kind: input, shape index: {}]   ;;  %s109_s1 = inlined_call_operand.hbm [shape: f32[8,256], index: 1, kind: output, shape index: {}]  }
   0x1   :  { %7 = vsyncpa [#allocation4], 0  ;;  %s90_s6 = smov [#allocation2]  }
   0x2   :  { %s14_s7 = sshll.u32 %s90_s6, 4  ;;  %s15_s7 = int_to_ptr.vmem [resolvable:$true] %s14_s7 }
   0x3   :  { %s54_s8 = scalar_lea.vmem %s15_s7, 256  ;;  %p59_p1 = scmp.lt.s32.totalorder %s15_s7, %s15_s7 }
   0x4   :  { %p55_p0 = scmp.ne.s32.totalorder %s15_s7, %s54_s8  ;;  %p60_p2 = scmp.lt.s32.totalorder %s54_s8, %s54_s8 }
   0x6   :  { %p61_p3 = por %p60_p2, %p59_p1 }
   0x8   :  { %p62_p4 = pnand %p61_p3, %p55_p0 }
   0xa   :  { %65 = shalt.err (!%p62_p4)
}
   0xb   :  { %17 = dma.hbm_to_vmem [thread:$0]  %s108_s0, 256, %s15_s7, [#allocation3]  }
   0xc   :  { %86 = dma.done.wait [#allocation3], 256  }
   0xd   :  { %87 = vsyncadd [#allocation3], 4294967040  ;;  %v21_v0 = vld [vmem:[#allocation2] sm:$0xff]  ;;  %v22_v1 = vld [vmem:[#allocation2 + $0x8] sm:$0xff]  ;;  %s91_s11 = smov [#allocation5]  }
   0xe   :  { %s35_s12 = sshll.u32 %s91_s11, 4  ;;  %v23_v2 = vmax.f32 %v21_v0, 0.0  ;;  %v24_v3 = vmax.f32 %v22_v1, 0.0  ;;  %s36_s12 = int_to_ptr.vmem [resolvable:$true] %s35_s12 }
   0xf   :  { %s66_s13 = scalar_lea.vmem %s36_s12, 256  ;;  %p71_p6 = scmp.lt.s32.totalorder %s36_s12, %s36_s12 }
  0x10   :  { %v25_v4 = vmul.f32 %v23_v2, %v23_v2  ;;  %v26_v5 = vmul.f32 %v24_v3, %v24_v3  ;;  %p67_p5 = scmp.ne.s32.totalorder %s36_s12, %s66_s13  ;;  %p72_p7 = scmp.lt.s32.totalorder %s66_s13, %s66_s13 }
  0x12   :  { %27 = vst [vmem:[#allocation5] sm:$0xff] %v25_v4  ;;  %28 = vst [vmem:[#allocation5 + $0x8] sm:$0xff] %v26_v5  ;;  %p73_p8 = por %p72_p7, %p71_p6 }
  0x14   :  { %p74_p9 = pnand %p73_p8, %p67_p5 }
  0x16   :  { %77 = shalt.err (!%p74_p9)
}
  0x17   :  { %38 = dma.vmem_to_hbm [thread:$0]  %s36_s12, 256, %s109_s1, [#allocation4]  }
  0x18   :  { %88 = dma.done.wait [#allocation4], 256  }
  0x19   :  { %89 = vsyncadd [#allocation4], 4294967040 }
  0x1a   :  { %42 = vsyncpa [#allocation3], 1 }
  0x1b   :  { %43 = vsyncpa [#allocation4], 1 }

</bundles_post_ra>
